<compile_context>
chip_gen: v7x
topology: tpu7x:2x2x1
jax: 0.10.0
libtpu: 0.0.40
codegen_flags: <defaults>
</compile_context>

<pallas_src>
import jax
import jax.numpy as jnp
import numpy as np
from jax import lax
from jax.experimental import pallas as pl
from jax.experimental.pallas import tpu as pltpu


# ----------------------------- Pallas kernel --------------------------------

def _sdf_kernel(p_ref, aux_ref, out_ref):
    # p_ref   : (TP, 8)   columns [px, py, pz, |p|^2, thresh, 0, 0, 0]
    # aux_ref : (24, V)   rows 0-2: v, 3-7: 0, 8-10: vn, 11-15: 0,
    #                     16: |v|^2, 17: vn.v, 18: 1/sr, 19-23: 0
    # out_ref : (1, 1)    per-batch accumulator: sum_p sdf(p)^2

    @pl.when(pl.program_id(1) == 0)
    def _init():
        out_ref[...] = jnp.zeros_like(out_ref)

    pa = p_ref[...]                              # (TP, 8)
    psq = pa[:, 3:4]                             # (TP, 1)
    thresh = pa[:, 4:5]                          # (TP, 1)

    # MXU: p.v and p.vn (padding columns/rows are zero so only x,y,z contribute).
    pv = jnp.dot(pa, aux_ref[0:8, :],
                 preferred_element_type=jnp.float32,
                 precision=jax.lax.Precision.HIGHEST)     # (TP, V)
    pvn = jnp.dot(pa, aux_ref[8:16, :],
                  preferred_element_type=jnp.float32,
                  precision=jax.lax.Precision.HIGHEST)    # (TP, V)

    vsq = aux_ref[16:17, :]                      # (1, V)
    vnv = aux_ref[17:18, :]                      # (1, V)
    inv_sr = aux_ref[18:19, :]                   # (1, V)

    d = (psq + vsq) - 2.0 * pv                   # squared distances (TP, V)
    # KNN membership via per-point K-th-distance threshold (replaces dense mask).
    mask = (d <= thresh).astype(jnp.float32)

    t = 1.0 - d * inv_sr                         # t > 0  <=>  d < sr
    t2 = t * t
    # NOTE: select happens before the mask multiply so any huge t^4 in the
    # discarded branch never meets the 0 of the mask (no inf*0 NaNs).
    phi = jnp.where(t > 0.0, t2 * t2, jnp.float32(1e-18)) * mask

    dot = pvn - vnv                              # <vn, p - v>  (TP, V)

    num = jnp.sum(phi * dot, axis=1, keepdims=True)   # (TP, 1)
    den = jnp.sum(phi, axis=1, keepdims=True)         # (TP, 1)
    inv_den = pl.reciprocal(den, approx=True)          # EUP
    inv_den = inv_den * (2.0 - den * inv_den)          # one Newton step
    sdf = num * inv_den                                # (TP, 1)

    out_ref[...] += jnp.sum(sdf * sdf)


# ----------------------------- tiling helpers --------------------------------

def _vmem_capacity_bytes():
    try:
        info = pltpu.get_tpu_info()
        for attr in ("vmem_capacity_bytes", "vmem_bytes"):
            cap = getattr(info, attr, None)
            if cap:
                return int(cap)
    except Exception:
        pass
    return 64 * 1024 * 1024  # conservative (v7x-sized) fallback


def _choose_p_tile(P, V, budget_bytes):
    """Largest P-tile whose live footprint fits the VMEM budget."""
    def live_bytes(tp):
        # ~8 live (TP,V) f32 temporaries + double-buffered input blocks + aux
        return 8 * 4 * tp * V + 2 * (tp * 8 * 4) + 2 * (24 * V * 4)

    cands = [t for t in (1024, 512, 256, 128, 64, 32, 16, 8)
             if t < P and P % t == 0]
    if P <= 1024:
        cands.insert(0, P)
    for tp in cands:
        if live_bytes(tp) <= budget_bytes:
            return tp
    return cands[-1] if cands else P


def _sdf_pallas(p_aug, aux):
    """p_aug (N,P,8), aux (N,24,Vp) -> (N,) sum_p sdf^2."""
    N, P, _ = p_aug.shape
    Vp = aux.shape[-1]

    vmem_cap = _vmem_capacity_bytes()
    vmem_limit = min(int(vmem_cap * 3 // 4), 100 * 1024 * 1024)
    TP = _choose_p_tile(P, Vp, budget_bytes=vmem_limit // 2)
    grid = (N, P // TP)

    flops = int(N * P * Vp * 42)                     # 2 MXU matmuls (K=8) + VALU
    transcendentals = int(N * P)                     # approx reciprocals
    bytes_accessed = int(4 * (N * P * 8 + N * 24 * Vp * (P // TP) + N))

    out = pl.pallas_call(
        _sdf_kernel,
        out_shape=jax.ShapeDtypeStruct((N, 1, 1), jnp.float32),
        grid=grid,
        in_specs=[
            pl.BlockSpec((None, TP, 8), lambda n, t: (n, t, 0)),    # points slab
            pl.BlockSpec((None, 24, Vp), lambda n, t: (n, 0, 0)),   # vertex slab
        ],
        out_specs=pl.BlockSpec((None, 1, 1), lambda n, t: (n, 0, 0)),
        compiler_params=pltpu.CompilerParams(
            dimension_semantics=("parallel", "arbitrary"),
            vmem_limit_bytes=vmem_limit,
        ),
        cost_estimate=pl.CostEstimate(
            flops=flops,
            transcendentals=transcendentals,
            bytes_accessed=bytes_accessed,
        ),
    )(p_aug, aux)
    return out[:, 0, 0]


# ------------------------------ JAX glue -------------------------------------

class SDFPallas:
    """Mirror of the PyTorch `SDF` module (forward path, default flags)."""

    _PAD_COORD = 1.0e4   # far-away dummy vertex coordinate (never within KNN)

    def __init__(self, vertices, vertex_normals, knn_K=60):
        self.vertices = jnp.asarray(vertices, jnp.float32)            # (N, V, 3)
        self.vertex_normals = jnp.asarray(vertex_normals, jnp.float32)
        self.knn_K = knn_K
        N, V, _ = self.vertices.shape
        self._V = V

        # support radius per vertex: mean squared distance to the 6 nearest
        # (non-self) vertices, times 2  (knn_points returns squared dists).
        vsq = jnp.sum(self.vertices * self.vertices, axis=-1)         # (N, V)
        vv = jnp.einsum("nvc,nwc->nvw", self.vertices, self.vertices,
                        precision=jax.lax.Precision.HIGHEST)
        d_vv = vsq[:, :, None] + vsq[:, None, :] - 2.0 * vv           # (N, V, V)
        k7 = min(7, V)
        neg_vals, _ = lax.top_k(-d_vv, k7)
        dists = -neg_vals                                             # ascending
        self.support_radii = dists[..., 1:].mean(-1) * 2.0            # (N, V)
        self._vsq = vsq

        # ---- one-time padded, coordinate-major aux slab: (N, 24, Vp) ----
        Vp = ((V + 127) // 128) * 128
        pad = Vp - V
        v_p = jnp.pad(self.vertices, ((0, 0), (0, pad), (0, 0)),
                      constant_values=self._PAD_COORD)
        vn_p = jnp.pad(self.vertex_normals, ((0, 0), (0, pad), (0, 0)))   # zeros
        vsq_p = jnp.sum(v_p * v_p, axis=-1)                               # (N, Vp)
        vnv_p = jnp.sum(vn_p * v_p, axis=-1)                              # (N, Vp)
        inv_sr_p = jnp.pad(1.0 / self.support_radii, ((0, 0), (0, pad)),
                           constant_values=1.0)                           # (N, Vp)

        z5 = jnp.zeros((N, 5, Vp), jnp.float32)
        self._aux = jnp.concatenate(
            [jnp.transpose(v_p, (0, 2, 1)), z5,      # rows 0-2 v,  3-7  zero
             jnp.transpose(vn_p, (0, 2, 1)), z5,     # rows 8-10 vn, 11-15 zero
             vsq_p[:, None, :],                      # row 16 |v|^2
             vnv_p[:, None, :],                      # row 17 vn.v
             inv_sr_p[:, None, :],                   # row 18 1/sr
             jnp.zeros((N, 5, Vp), jnp.float32)],    # rows 19-23 zero
            axis=1)                                  # (N, 24, Vp)
        self._Vp = Vp

    def forward(self, points):
        points = jnp.asarray(points, jnp.float32)
        if points.ndim == 2:
            points = points[None]
        N, P, _ = points.shape
        V = self._V
        K = min(self.knn_K, V)

        # ---- KNN threshold (data-dependent top_k stays in plain JAX) ----
        psq = jnp.sum(points * points, axis=-1)                        # (N, P)
        pv = jnp.einsum("npc,nvc->npv", points, self.vertices,
                        precision=jax.lax.Precision.HIGHEST)           # (N, P, V)
        d_pv = psq[..., None] + self._vsq[:, None, :] - 2.0 * pv       # (N, P, V)

        if K < V:
            neg_vals, _ = lax.top_k(-d_pv, K + 1)
            dk = -neg_vals[..., K - 1]
            dk1 = -neg_vals[..., K]
            thresh = 0.5 * (dk + dk1)       # midpoint -> robust exact-K selection
        else:
            neg_vals, _ = lax.top_k(-d_pv, K)
            thresh = -neg_vals[..., K - 1] * (1.0 + 1e-6) + 1e-6

        # points + |p|^2 + threshold in one lane-8 slab (single DMA per tile).
        p_aug = jnp.concatenate(
            [points, psq[..., None], thresh[..., None],
             jnp.zeros((N, P, 3), jnp.float32)], axis=-1)              # (N, P, 8)

        return _sdf_pallas(p_aug, self._aux)


# ------------------------------ reference ------------------------------------

def _pairwise_sqdist(a, b):
    # a: (N, M, 3), b: (N, V, 3) -> (N, M, V) squared L2 distances (direct diff)
    diff = a[:, :, None, :] - b[:, None, :, :]
    return jnp.sum(diff * diff, axis=-1)


def _reference(points, vertices, vertex_normals, support_radii, K):
    d_pv = _pairwise_sqdist(points, vertices)
    _, knn_idx = lax.top_k(-d_pv, K)
    N = points.shape[0]
    bidx = jnp.arange(N)[:, None, None]
    v = vertices[bidx, knn_idx]
    vn = vertex_normals[bidx, knn_idx]
    sr = support_radii[bidx, knn_idx]
    p_v = points[:, :, None, :] - v
    dists = jnp.sum(p_v * p_v, axis=-1)
    inside = dists < sr
    phi_v = jnp.where(inside, ((1.0 - dists / sr) ** 2) ** 2, 1e-18)
    dot = jnp.sum(vn * p_v, axis=-1)
    sdf = jnp.sum(phi_v * dot, axis=-1) / jnp.sum(phi_v, axis=-1)
    return jnp.sum(sdf ** 2, axis=-1)


# --------------------------------- main ---------------------------------------

if __name__ == "__main__":
    key = jax.random.PRNGKey(0)
    N, V, P, K = 2, 128, 64, 60

    k1, k2, k3 = jax.random.split(key, 3)
    vertices = jax.random.normal(k1, (N, V, 3), dtype=jnp.float32)
    normals = jax.random.normal(k2, (N, V, 3), dtype=jnp.float32)
    normals = normals / jnp.linalg.norm(normals, axis=-1, keepdims=True)
    points = jax.random.normal(k3, (N, P, 3), dtype=jnp.float32) * 0.8

    sdf_mod = SDFPallas(vertices, normals, knn_K=K)
    out = sdf_mod.forward(points)
    jax.block_until_ready(out)

    ref = _reference(points, sdf_mod.vertices, sdf_mod.vertex_normals,
                     sdf_mod.support_radii, K)
    np.testing.assert_allclose(np.asarray(out), np.asarray(ref),
                               rtol=5e-4, atol=5e-4)

    print("KERNEL_OK")
</pallas_src>

<mosaic_0001>
module attributes {stable_mosaic.version = 11 : i64} {
  func.func @_sdf_kernel(%arg0: i32, %arg1: i32, %arg2: memref<1x64x8xf32, #tpu.memory_space<vmem>>, %arg3: memref<1x24x128xf32, #tpu.memory_space<vmem>>, %arg4: memref<1x1x1xf32, #tpu.memory_space<vmem>>) attributes {dimension_semantics = [#tpu.dimension_semantics<parallel>, #tpu.dimension_semantics<arbitrary>], iteration_bounds = array<i64: 2, 1>, scalar_prefetch = 0 : i64, scratch_operands = 0 : i64, tpu.core_type = #tpu.core_type<tc>, window_params = [{transform_indices = @transform_0, window_bounds = array<i64: 1, 64, 8>}, {transform_indices = @transform_1, window_bounds = array<i64: 1, 24, 128>}, {transform_indices = @transform_2, window_bounds = array<i64: 1, 1, 1>}]} {
    %c0_i32 = arith.constant 0 : i32
    %0 = arith.cmpi eq, %arg1, %c0_i32 : i32
    %1 = arith.extui %0 : i1 to i32
    %c0_i32_0 = arith.constant 0 : i32
    %2 = arith.cmpi ne, %1, %c0_i32_0 : i32
    scf.if %2 {
      %cst_29 = arith.constant 0.000000e+00 : f32
      %65 = vector.broadcast %cst_29 : f32 to vector<1x1xf32>
      %c0_30 = arith.constant 0 : index
      %c0_31 = arith.constant 0 : index
      %c0_32 = arith.constant 0 : index
      %66 = vector.load %arg4[%c0_30, %c0_31, %c0_32] : memref<1x1x1xf32, #tpu.memory_space<vmem>>, vector<1x1x1xf32>
      %67 = vector.shape_cast %66 : vector<1x1x1xf32> to vector<1x1xf32>
      %68 = vector.shape_cast %65 : vector<1x1xf32> to vector<1x1x1xf32>
      tpu.vector_store %arg4[%c0_30, %c0_31, %c0_32], %68 {strides = array<i32>} : memref<1x1x1xf32, #tpu.memory_space<vmem>>, vector<1x1x1xf32>,
    } else {
    }
    %c0 = arith.constant 0 : index
    %c0_1 = arith.constant 0 : index
    %c0_2 = arith.constant 0 : index
    %3 = vector.load %arg2[%c0, %c0_1, %c0_2] : memref<1x64x8xf32, #tpu.memory_space<vmem>>, vector<1x64x8xf32>
    %4 = vector.shape_cast %3 : vector<1x64x8xf32> to vector<64x8xf32>
    %5 = vector.extract_strided_slice %4 {offsets = [0, 3], sizes = [64, 1], strides = [1, 1]} : vector<64x8xf32> to vector<64x1xf32>
    %6 = vector.extract_strided_slice %4 {offsets = [0, 4], sizes = [64, 1], strides = [1, 1]} : vector<64x8xf32> to vector<64x1xf32>
    %c0_3 = arith.constant 0 : index
    %c0_4 = arith.constant 0 : index
    %c0_5 = arith.constant 0 : index
    %7 = vector.load %arg3[%c0_3, %c0_4, %c0_5] : memref<1x24x128xf32, #tpu.memory_space<vmem>>, vector<1x8x128xf32>
    %8 = vector.shape_cast %7 : vector<1x8x128xf32> to vector<8x128xf32>
    %cst = arith.constant dense<0.000000e+00> : vector<64x128xf32>
    %9 = tpu.matmul %4, %8, %cst {dimension_numbers = #tpu.dot_dimension_numbers<[1], [0], [0], [1], [0, 0, 1, 1], [], []>, precision = #tpu.contract_precision<fp32>} : vector<64x8xf32>, vector<8x128xf32>, vector<64x128xf32> -> vector<64x128xf32>
    %c0_6 = arith.constant 0 : index
    %c8 = arith.constant 8 : index
    %c0_7 = arith.constant 0 : index
    %10 = vector.load %arg3[%c0_6, %c8, %c0_7] : memref<1x24x128xf32, #tpu.memory_space<vmem>>, vector<1x8x128xf32>
    %11 = vector.shape_cast %10 : vector<1x8x128xf32> to vector<8x128xf32>
    %cst_8 = arith.constant dense<0.000000e+00> : vector<64x128xf32>
    %12 = tpu.matmul %4, %11, %cst_8 {dimension_numbers = #tpu.dot_dimension_numbers<[1], [0], [0], [1], [0, 0, 1, 1], [], []>, precision = #tpu.contract_precision<fp32>} : vector<64x8xf32>, vector<8x128xf32>, vector<64x128xf32> -> vector<64x128xf32>
    %c0_9 = arith.constant 0 : index
    %c16 = arith.constant 16 : index
    %c0_10 = arith.constant 0 : index
    %13 = vector.load %arg3[%c0_9, %c16, %c0_10] : memref<1x24x128xf32, #tpu.memory_space<vmem>>, vector<1x1x128xf32>
    %14 = vector.shape_cast %13 : vector<1x1x128xf32> to vector<1x128xf32>
    %c0_11 = arith.constant 0 : index
    %c17 = arith.constant 17 : index
    %c0_12 = arith.constant 0 : index
    %15 = vector.load %arg3[%c0_11, %c17, %c0_12] : memref<1x24x128xf32, #tpu.memory_space<vmem>>, vector<1x1x128xf32>
    %16 = vector.shape_cast %15 : vector<1x1x128xf32> to vector<1x128xf32>
    %c0_13 = arith.constant 0 : index
    %c18 = arith.constant 18 : index
    %c0_14 = arith.constant 0 : index
    %17 = vector.load %arg3[%c0_13, %c18, %c0_14] : memref<1x24x128xf32, #tpu.memory_space<vmem>>, vector<1x1x128xf32>
    %18 = vector.shape_cast %17 : vector<1x1x128xf32> to vector<1x128xf32>
    %19 = vector.broadcast %5 : vector<64x1xf32> to vector<64x128xf32>
    %20 = vector.broadcast %14 : vector<1x128xf32> to vector<64x128xf32>
    %21 = arith.addf %19, %20 : vector<64x128xf32>
    %cst_15 = arith.constant 2.000000e+00 : f32
    %22 = vector.broadcast %cst_15 : f32 to vector<64x128xf32>
    %23 = arith.mulf %22, %9 : vector<64x128xf32>
    %24 = arith.subf %21, %23 : vector<64x128xf32>
    %25 = vector.broadcast %6 : vector<64x1xf32> to vector<64x128xf32>
    %26 = arith.cmpf ole, %24, %25 : vector<64x128xf32>
    %27 = arith.extui %26 : vector<64x128xi1> to vector<64x128xi32>
    %28 = arith.sitofp %27 : vector<64x128xi32> to vector<64x128xf32>
    %29 = vector.broadcast %18 : vector<1x128xf32> to vector<64x128xf32>
    %30 = arith.mulf %24, %29 : vector<64x128xf32>
    %cst_16 = arith.constant 1.000000e+00 : f32
    %31 = vector.broadcast %cst_16 : f32 to vector<64x128xf32>
    %32 = arith.subf %31, %30 : vector<64x128xf32>
    %33 = arith.mulf %32, %32 : vector<64x128xf32>
    %cst_17 = arith.constant 0.000000e+00 : f32
    %34 = vector.broadcast %cst_17 : f32 to vector<64x128xf32>
    %35 = arith.cmpf ogt, %32, %34 : vector<64x128xf32>
    %36 = arith.mulf %33, %33 : vector<64x128xf32>
    %cst_18 = arith.constant 1.000000e-18 : f32
    %37 = vector.broadcast %cst_18 : f32 to vector<64x128xf32>
    %38 = arith.select %35, %36, %37 : vector<64x128xi1>, vector<64x128xf32>
    %39 = arith.mulf %38, %28 : vector<64x128xf32>
    %40 = vector.broadcast %16 : vector<1x128xf32> to vector<64x128xf32>
    %41 = arith.subf %12, %40 : vector<64x128xf32>
    %42 = arith.mulf %39, %41 : vector<64x128xf32>
    %cst_19 = arith.constant dense<0.000000e+00> : vector<64xf32>
    %43 = vector.multi_reduction <add>, %42, %cst_19 [1] : vector<64x128xf32> to vector<64xf32>
    %44 = vector.shape_cast %43 : vector<64xf32> to vector<64x1xf32>
    %cst_20 = arith.constant dense<0.000000e+00> : vector<64xf32>
    %45 = vector.multi_reduction <add>, %39, %cst_20 [1] : vector<64x128xf32> to vector<64xf32>
    %46 = vector.shape_cast %45 : vector<64xf32> to vector<64x1xf32>
    %47 = tpu.reciprocal %46 {approx = true} : vector<64x1xf32> -> vector<64x1xf32>
    %48 = arith.mulf %46, %47 : vector<64x1xf32>
    %cst_21 = arith.constant 2.000000e+00 : f32
    %49 = vector.broadcast %cst_21 : f32 to vector<64x1xf32>
    %50 = arith.subf %49, %48 : vector<64x1xf32>
    %51 = arith.mulf %47, %50 : vector<64x1xf32>
    %52 = arith.mulf %44, %51 : vector<64x1xf32>
    %c0_22 = arith.constant 0 : index
    %c0_23 = arith.constant 0 : index
    %c0_24 = arith.constant 0 : index
    %53 = vector.load %arg4[%c0_22, %c0_23, %c0_24] : memref<1x1x1xf32, #tpu.memory_space<vmem>>, vector<1x1x1xf32>
    %54 = vector.shape_cast %53 : vector<1x1x1xf32> to vector<1x1xf32>
    %55 = arith.mulf %52, %52 : vector<64x1xf32>
    %56 = vector.shape_cast %55 : vector<64x1xf32> to vector<1x64x1xf32>
    %cst_25 = arith.constant dense<0.000000e+00> : vector<1xf32>
    %57 = vector.multi_reduction <add>, %56, %cst_25 [1, 2] : vector<1x64x1xf32> to vector<1xf32>
    %58 = vector.shape_cast %57 : vector<1xf32> to vector<1x1x1xf32>
    %59 = vector.extract %58[0, 0, 0] : f32 from vector<1x1x1xf32>
    %60 = vector.broadcast %59 : f32 to vector<1x1xf32>
    %61 = arith.addf %54, %60 : vector<1x1xf32>
    %c0_26 = arith.constant 0 : index
    %c0_27 = arith.constant 0 : index
    %c0_28 = arith.constant 0 : index
    %62 = vector.load %arg4[%c0_26, %c0_27, %c0_28] : memref<1x1x1xf32, #tpu.memory_space<vmem>>, vector<1x1x1xf32>
    %63 = vector.shape_cast %62 : vector<1x1x1xf32> to vector<1x1xf32>
    %64 = vector.shape_cast %61 : vector<1x1xf32> to vector<1x1x1xf32>
    tpu.vector_store %arg4[%c0_26, %c0_27, %c0_28], %64 {strides = array<i32>} : memref<1x1x1xf32, #tpu.memory_space<vmem>>, vector<1x1x1xf32>,
    return
  }
  func.func @transform_0(%arg0: i32, %arg1: i32) -> (i32, i32, i32) {
    %c0_i32 = arith.constant 0 : i32
    %c0_i32_0 = arith.constant 0 : i32
    return %arg0, %arg1, %c0_i32 : i32, i32, i32
  }
  func.func @transform_1(%arg0: i32, %arg1: i32) -> (i32, i32, i32) {
    %c0_i32 = arith.constant 0 : i32
    %c0_i32_0 = arith.constant 0 : i32
    %c0_i32_1 = arith.constant 0 : i32
    return %arg0, %c0_i32, %c0_i32_0 : i32, i32, i32
  }
  func.func @transform_2(%arg0: i32, %arg1: i32) -> (i32, i32, i32) {
    %c0_i32 = arith.constant 0 : i32
    %c0_i32_0 = arith.constant 0 : i32
    %c0_i32_1 = arith.constant 0 : i32
    return %arg0, %c0_i32, %c0_i32_0 : i32, i32, i32
  }
}

</mosaic_0001>

<bundles_post_ra>
// kernel: tpu_custom_call.1
= control target key start
LH: loop header
LB: loop body
LE: loop exit
PB: predicated region body
PF: predicated region fallthrough
CT: control target
= control target key end

     0   :  { %s2577_s9 = smov 0   ;;  %s2579_s10 = smov 0   ;;  %s2974_s0 = inlined_call_operand.vmem [shape: f32[2,64,8], index: 0, kind: input, shape index: {}]   ;;  %s2975_s1 = inlined_call_operand.vmem [shape: f32[2,24,128], index: 1, kind: input, shape index: {}]   ;;  %s2976_s2 = inlined_call_operand.vmem [shape: f32[2,1,1], index: 2, kind: output, shape index: {}]  }
   0x1   :  { %s2581_s11 = smov 0  }
   0x2 LB: > { %s24_s12 = sadd.s32 1, %s2553_s10  ;;  %p2109_p0 = scmp.ge.s32.totalorder %s2557_s11, 1  ;;  %s2557_s11 = sphi %s2581_s11, %s12_s11   ;;  %s2553_s10 = sphi %s2579_s10, %s2978_s10   ;;  %s2549_s9 = sphi %s2577_s9, %s2977_s9  }
   0x3   : > { %p26_p1 = scmp.ge.s32.totalorder %s24_s12, 2  ;;  %p141_p2 = scmp.lt.s32.totalorder %s2557_s11, 3 }
   0x5   : > { %s2980_s12 = smov (%p26_p1, %s24_s12), 0  ;;  %p142_p3 = pnand %p2109_p0, %p141_p2 }
   0x6   : > { %p171_p4 = scmp.lt.s32.totalorder (!%p142_p3), %s2549_s9, 1  ;;  %v2559_v0 = vmov (!%p142_p3), 3   ;;  %vm203_vm0 = vcmask (!%p142_p3), 64512  }
   0x7   : > { %145 = sbr.rel (%p142_p3) target bundleno = 731 (0x2db), region = 28  ;;  %2513 = vset.pattern.permute.xlu0 (!%p142_p3), %v2559_v0  ;;  %2514 = vset.pattern.permute.xlu1 (!%p142_p3), %v2559_v0 }
   0xe   : > { %s2982_s9 = smov (!%p171_p4, %s2549_s9), 1 }
   0xf   : > { %s2483_s13 = smul.u32 24, %s2982_s9  ;;  %s2126_s14 = sshll.u32 %s2982_s9, 6 }
  0x10   : > { %s2604_s17 = scalar_lea.vmem %s2974_s0, %s2126_s14  ;;  %s187_s23 = scalar_lea.vmem %s2976_s2, %s2982_s9 }
  0x11   : > { %s2609_s20 = scalar_lea.vmem %s2975_s1, %s2483_s13  ;;  %v2612_v1 = vld [vmem:[%s2604_s17] sm:$0xff]  ;;  %v2615_v2 = vld [vmem:[%s2604_s17 + $0x8] sm:$0xff]  ;;  %v2618_v3 = vld [vmem:[%s2604_s17 + $0x10] sm:$0xff] }
  0x12   : > { %v202_v4 = vld [vmem:[%s2609_s20] sm:$0xff]  ;;  %v975_v5 = vld [vmem:[%s2609_s20 + $0x8] sm:$0xff]  ;;  %v205_v6 = vsel %vm203_vm0, %v2612_v1, 0  ;;  %v208_v7 = vsel %vm203_vm0, %v2615_v2, 0  ;;  %v211_v8 = vsel %vm203_vm0, %v2618_v3, 0  ;;  %v2629_v9 = vld [vmem:[%s2604_s17 + $0x18] sm:$0xff]  ;;  %1727 = vperm.xlu0 %2513, %v2612_v1   ;;  %1735 = vperm.xlu1 %2514, %v2618_v3  }
  0x13   : > { %v2633_v10 = vand.u32 4294901760, %v202_v4  ;;  %v2635_v11 = vand.u32 4294901760, %v975_v5  ;;  %v2637_v12 = vand.u32 4294901760, %v205_v6  ;;  %v2639_v13 = vand.u32 4294901760, %v208_v7  ;;  %v2642_v14 = vld [vmem:[%s2604_s17 + $0x20] sm:$0xff]  ;;  %v2645_v15 = vld [vmem:[%s2604_s17 + $0x28] sm:$0xff] }
  0x14   : > { %v2647_v16 = vand.u32 4294901760, %v211_v8  ;;  %v214_v17 = vsel %vm203_vm0, %v2629_v9, 0  ;;  %v217_v18 = vsel %vm203_vm0, %v2642_v14, 0  ;;  %v220_v19 = vsel %vm203_vm0, %v2645_v15, 0  ;;  %v2656_v20 = vld [vmem:[%s2604_s17 + $0x30] sm:$0xff]  ;;  %v2728_v45 = vld [vmem:[%s2604_s17 + $0x38] sm:$0xff] }
  0x15   : > { %2235 = vmatprep.subr.mxu0 %v2633_v10  ;;  %2319 = vmatprep.subr.mxu1 %v2635_v11  ;;  %v2661_v21 = vsub.f32 %v205_v6, %v2637_v12  ;;  %v2664_v22 = vsub.f32 %v202_v4, %v2633_v10  ;;  %v2667_v23 = vsub.f32 %v208_v7, %v2639_v13  ;;  %v2669_v24 = vand.u32 4294901760, %v214_v17 }
  0x16   : > { %2236 = vmatpush3.msra.mxu0 %v2633_v10  ;;  %2320 = vmatpush3.msra.mxu1 %v2635_v11  ;;  %v2674_v25 = vsub.f32 %v211_v8, %v2647_v16  ;;  %v2676_v26 = vand.u32 4294901760, %v217_v18  ;;  %v2678_v27 = vand.u32 4294901760, %v220_v19  ;;  %v223_v28 = vsel %vm203_vm0, %v2656_v20, 0 }
  0x17   : > { %v2683_v29 = vand.u32 4294901760, %v2661_v21  ;;  %v2686_v30 = vand.u32 4294901760, %v2664_v22  ;;  %v2689_v31 = vand.u32 4294901760, %v2667_v23  ;;  %v2692_v32 = vsub.f32 %v214_v17, %v2669_v24  ;;  %1731 = vperm.xlu0 %2513, %v2615_v2   ;;  %1739 = vperm.xlu1 %2514, %v2629_v9  }
  0x18   : > { %v2697_v33 = vand.u32 4294901760, %v2674_v25  ;;  %v2700_v34 = vsub.f32 %v217_v18, %v2676_v26  ;;  %v2703_v35 = vsub.f32 %v220_v19, %v2678_v27  ;;  %v2705_v36 = vand.u32 4294901760, %v223_v28 }
  0x19   : > { %v297_v37 = vsub.f32 %v2661_v21, %v2683_v29  ;;  %v378_v38 = vsub.f32 %v2664_v22, %v2686_v30  ;;  %v307_v39 = vsub.f32 %v2667_v23, %v2689_v31  ;;  %v2714_v40 = vand.u32 4294901760, %v2692_v32 }
  0x1a   : > { %v317_v41 = vsub.f32 %v2674_v25, %v2697_v33  ;;  %v2719_v42 = vand.u32 4294901760, %v2700_v34  ;;  %v2722_v43 = vand.u32 4294901760, %v2703_v35  ;;  %v2725_v44 = vsub.f32 %v223_v28, %v2705_v36 }
  0x1b   : > { %v298_v46 = vand.u32 4294901760, %v297_v37  ;;  %v379_v47 = vand.u32 4294901760, %v378_v38  ;;  %v308_v48 = vand.u32 4294901760, %v307_v39  ;;  %v327_v49 = vsub.f32 %v2692_v32, %v2714_v40  ;;  %1743 = vperm.xlu0 %2513, %v2642_v14   ;;  %1747 = vperm.xlu1 %2514, %v2645_v15  }
  0x1c   : > { %v318_v50 = vand.u32 4294901760, %v317_v41  ;;  %v337_v51 = vsub.f32 %v2700_v34, %v2719_v42  ;;  %v2737_v52 = vand.u32 4294901760, %v2725_v44  ;;  %v226_v53 = vsel %vm203_vm0, %v2728_v45, 0 }
  0x1d   : > { %2237 = vmatprep.mubr.f32.mxu0 %v298_v46  ;;  %2249 = vmatprep.subr.mxu0 %v379_v47  ;;  %v1124_v54 = vsub.f32 %v975_v5, %v2635_v11  ;;  %v328_v55 = vand.u32 4294901760, %v327_v49  ;;  %v347_v56 = vsub.f32 %v2703_v35, %v2722_v43  ;;  %v2744_v57 = vand.u32 4294901760, %v226_v53 }
  0x1e   : > { %2321 = vmatprep.mubr.f32.mxu1 %v298_v46  ;;  %2238 = vmatmul.mubr.f32.vlgmr.msra.gmra.mrb[0].mxu0 %v308_v48  ;;  %v338_v58 = vand.u32 4294901760, %v337_v51  ;;  %v357_v59 = vsub.f32 %v2725_v44, %v2737_v52  ;;  %v2560_v5 = vmov 4  }
  0x1f   : > { %2250 = vmatpush3.msra.mxu0 %v379_v47  ;;  %2322 = vmatmul.mubr.f32.vlgmr.msra.gmra.mrb[0].mxu1 %v308_v48  ;;  %v2748_v60 = vand.u32 4294901760, %v1124_v54  ;;  %v2751_v61 = vsub.f32 %v226_v53, %v2744_v57  ;;  %v348_v63 = vand.u32 4294901760, %v347_v56 }
  0x20   : > { %2240 = vmatprep.mubr.f32.mxu0 %v318_v50  ;;  %2324 = vmatprep.mubr.f32.mxu1 %v318_v50  ;;  %v358_v6 = vand.u32 4294901760, %v357_v59 }
  0x21   : > { %v1126_v62 = vsub.f32 %v1124_v54, %v2748_v60  ;;  %2263 = vmatprep.subr.mxu0 %v2664_v22  ;;  %1751 = vperm.xlu0 %2513, %v2656_v20   ;;  %v2757_v4 = vand.u32 4294901760, %v2751_v61 }
  0x22   : > { %2241 = vmatmul.mubr.f32.gmra.mrb[2].mxu0 %v328_v55  ;;  %2515 = vset.pattern.permute.xlu1 %v2560_v5 }
  0x23   : > { %2325 = vmatmul.mubr.f32.gmra.mrb[2].mxu1 %v328_v55  ;;  %2243 = vmatprep.mubr.f32.mxu0 %v338_v58  ;;  %v1127_v7 = vand.u32 4294901760, %v1126_v62  ;;  %v367_v8 = vsub.f32 %v2751_v61, %v2757_v4 }
  0x24   : > { %2327 = vmatprep.mubr.f32.mxu1 %v338_v58  ;;  %1787 = vperm.xlu1 %2515, %v2612_v1  }
  0x25   : > { %2333 = vmatprep.subr.mxu1 %v1127_v7  ;;  %2516 = vset.pattern.permute.xlu0 %v2560_v5  ;;  %v368_v17 = vand.u32 4294901760, %v367_v8 }
  0x26   : > { %2244 = vmatmul.mubr.f32.gmra.mrb[4].mxu0 %v348_v63  ;;  %2334 = vmatpush3.msra.mxu1 %v1127_v7 }
  0x27   : > { %2328 = vmatmul.mubr.f32.gmra.mrb[4].mxu1 %v348_v63  ;;  %2246 = vmatprep.mubr.f32.mxu0 %v358_v6 }
  0x28   : > { %2330 = vmatprep.mubr.f32.mxu1 %v358_v6  ;;  %2347 = vmatprep.subr.mxu1 %v1124_v54 }
  0x29   : > { %1791 = vperm.xlu0 %2516, %v2615_v2   ;;  %2517 = vset.pattern.permute.xlu1 %v2559_v0 }
  0x2a   : > { %2247 = vmatmul.mubr.f32.gmra.mrb[6].mxu0 %v368_v17  ;;  %1755 = vperm.xlu1 %2517, %v2728_v45  }
  0x2b   : > { %2331 = vmatmul.mubr.f32.gmra.mrb[6].mxu1 %v368_v17  ;;  %2251 = vmatprep.mubr.f32.mxu0 %v2637_v12 }
  0x2c   : > { %2335 = vmatprep.mubr.f32.mxu1 %v2637_v12 }
  0x2d   : > { %1799 = vperm.xlu0 %2516, %v2629_v9  }
  0x2e   : > { %2252 = vmatmul.mubr.f32.vlgmr.msra.gmra.mrb[0].mxu0 %v2639_v13  ;;  %2518 = vset.pattern.permute.xlu1 %v2560_v5 }
  0x2f   : > { %2264 = vmatpush3.msra.mxu0 %v2664_v22  ;;  %2336 = vmatmul.mubr.f32.vlgmr.msra.gmra.mrb[0].mxu1 %v2639_v13  ;;  %v2868_v22 = vld [vmem:[%s2609_s20 + $0x12] ss:$0 sm:$0xff] }
  0x30   : > { %2254 = vmatprep.mubr.f32.mxu0 %v2647_v16  ;;  %2338 = vmatprep.mubr.f32.mxu1 %v2647_v16 }
  0x31   : > { %2277 = vmatprep.subr.mxu0 %v2633_v10  ;;  %2348 = vmatpush3.msra.mxu1 %v1124_v54  ;;  %v2561_v54 = vmov 0.0  }
  0x32   : > { %2255 = vmatmul.mubr.f32.gmra.mrb[2].mxu0 %v2669_v24  ;;  %2361 = vmatprep.subr.mxu1 %v2635_v11 }
  0x33   : > { %2339 = vmatmul.mubr.f32.gmra.mrb[2].mxu1 %v2669_v24  ;;  %2257 = vmatprep.mubr.f32.mxu0 %v2676_v26 }
  0x34   : > { %2341 = vmatprep.mubr.f32.mxu1 %v2676_v26  ;;  %1795 = vperm.xlu1 %2518, %v2618_v3  }
  0x35   : > { %1807 = vperm.xlu0 %2516, %v2645_v15  }
  0x36   : > { %2258 = vmatmul.mubr.f32.gmra.mrb[4].mxu0 %v2678_v27 }
  0x37   : > { %2342 = vmatmul.mubr.f32.gmra.mrb[4].mxu1 %v2678_v27  ;;  %2260 = vmatprep.mubr.f32.mxu0 %v2705_v36 }
  0x38   : > { %2344 = vmatprep.mubr.f32.mxu1 %v2705_v36  ;;  %1803 = vperm.xlu1 %2518, %v2642_v14   ;;  %v2113_v14 = vld [vmem:[%s2609_s20 + $0x10] ss:$0 sm:$0xff] }
  0x39   : > { %1815 = vperm.xlu0 %2516, %v2728_v45  }
  0x3a   : > { %2261 = vmatmul.mubr.f32.gmra.mrb[6].mxu0 %v2744_v57 }
  0x3b   : > { %2345 = vmatmul.mubr.f32.gmra.mrb[6].mxu1 %v2744_v57  ;;  %2265 = vmatprep.mubr.f32.mxu0 %v2661_v21 }
  0x3c   : > { %2349 = vmatprep.mubr.f32.mxu1 %v2661_v21  ;;  %1811 = vperm.xlu1 %2518, %v2656_v20  }
  0x3e   : > { %2266 = vmatmul.mubr.f32.vlgmr.msra.gmra.mrb[0].mxu0 %v2667_v23 }
  0x3f   : > { %2278 = vmatpush3.msra.mxu0 %v2633_v10  ;;  %2350 = vmatmul.mubr.f32.vlgmr.msra.gmra.mrb[0].mxu1 %v2667_v23 }
  0x40   : > { %2268 = vmatprep.mubr.f32.mxu0 %v2674_v25  ;;  %2352 = vmatprep.mubr.f32.mxu1 %v2674_v25 }
  0x41   : > { %2291 = vmatprep.subr.mxu0 %v2686_v30  ;;  %2362 = vmatpush3.msra.mxu1 %v2635_v11 }
  0x42   : > { %2269 = vmatmul.mubr.f32.gmra.mrb[2].mxu0 %v2692_v32  ;;  %2375 = vmatprep.subr.mxu1 %v2748_v60 }
  0x43   : > { %2353 = vmatmul.mubr.f32.gmra.mrb[2].mxu1 %v2692_v32  ;;  %2271 = vmatprep.mubr.f32.mxu0 %v2700_v34 }
  0x44   : > { %2355 = vmatprep.mubr.f32.mxu1 %v2700_v34 }
  0x46   : > { %2272 = vmatmul.mubr.f32.gmra.mrb[4].mxu0 %v2703_v35 }
  0x47   : > { %2356 = vmatmul.mubr.f32.gmra.mrb[4].mxu1 %v2703_v35  ;;  %2274 = vmatprep.mubr.f32.mxu0 %v2725_v44 }
  0x48   : > { %2358 = vmatprep.mubr.f32.mxu1 %v2725_v44 }
  0x4a   : > { %2275 = vmatmul.mubr.f32.gmra.mrb[6].mxu0 %v2751_v61 }
  0x4b   : > { %2359 = vmatmul.mubr.f32.gmra.mrb[6].mxu1 %v2751_v61  ;;  %2279 = vmatprep.mubr.f32.mxu0 %v2683_v29 }
  0x4c   : > { %2363 = vmatprep.mubr.f32.mxu1 %v2683_v29 }
  0x4e   : > { %2280 = vmatmul.mubr.f32.vlgmr.msra.gmra.mrb[0].mxu0 %v2689_v31 }
  0x4f   : > { %2292 = vmatpush3.msra.mxu0 %v2686_v30  ;;  %2364 = vmatmul.mubr.f32.vlgmr.msra.gmra.mrb[0].mxu1 %v2689_v31  ;;  %v2873_v30 = vld [vmem:[%s2609_s20 + $0x11] ss:$0 sm:$0xff] }
  0x50   : > { %2282 = vmatprep.mubr.f32.mxu0 %v2697_v33  ;;  %2366 = vmatprep.mubr.f32.mxu1 %v2697_v33 }
  0x51   : > { %2305 = vmatprep.subr.mxu0 %v2633_v10  ;;  %2376 = vmatpush3.msra.mxu1 %v2748_v60 }
  0x52   : > { %2283 = vmatmul.mubr.f32.gmra.mrb[2].mxu0 %v2714_v40  ;;  %2389 = vmatprep.subr.mxu1 %v2635_v11 }
  0x53   : > { %2367 = vmatmul.mubr.f32.gmra.mrb[2].mxu1 %v2714_v40  ;;  %2285 = vmatprep.mubr.f32.mxu0 %v2719_v42 }
  0x54   : > { %2369 = vmatprep.mubr.f32.mxu1 %v2719_v42 }
  0x56   : > { %2286 = vmatmul.mubr.f32.gmra.mrb[4].mxu0 %v2722_v43 }
  0x57   : > { %2370 = vmatmul.mubr.f32.gmra.mrb[4].mxu1 %v2722_v43  ;;  %2288 = vmatprep.mubr.f32.mxu0 %v2737_v52 }
  0x58   : > { %2372 = vmatprep.mubr.f32.mxu1 %v2737_v52 }
  0x5a   : > { %2289 = vmatmul.mubr.f32.gmra.mrb[6].mxu0 %v2757_v4 }
  0x5b   : > { %2373 = vmatmul.mubr.f32.gmra.mrb[6].mxu1 %v2757_v4  ;;  %2293 = vmatprep.mubr.f32.mxu0 %v2637_v12 }
  0x5c   : > { %2377 = vmatprep.mubr.f32.mxu1 %v2637_v12 }
  0x5e   : > { %2294 = vmatmul.mubr.f32.vlgmr.msra.gmra.mrb[0].mxu0 %v2639_v13 }
  0x5f   : > { %2306 = vmatpush3.msra.mxu0 %v2633_v10  ;;  %2378 = vmatmul.mubr.f32.vlgmr.msra.gmra.mrb[0].mxu1 %v2639_v13 }
  0x60   : > { %2296 = vmatprep.mubr.f32.mxu0 %v2647_v16  ;;  %2380 = vmatprep.mubr.f32.mxu1 %v2647_v16 }
  0x61   : > { %2390 = vmatpush3.msra.mxu1 %v2635_v11 }
  0x62   : > { %2297 = vmatmul.mubr.f32.gmra.mrb[2].mxu0 %v2669_v24 }
  0x63   : > { %2381 = vmatmul.mubr.f32.gmra.mrb[2].mxu1 %v2669_v24  ;;  %2299 = vmatprep.mubr.f32.mxu0 %v2676_v26 }
  0x64   : > { %2383 = vmatprep.mubr.f32.mxu1 %v2676_v26 }
  0x66   : > { %2300 = vmatmul.mubr.f32.gmra.mrb[4].mxu0 %v2678_v27 }
  0x67   : > { %2384 = vmatmul.mubr.f32.gmra.mrb[4].mxu1 %v2678_v27  ;;  %2302 = vmatprep.mubr.f32.mxu0 %v2705_v36 }
  0x68   : > { %2386 = vmatprep.mubr.f32.mxu1 %v2705_v36 }
  0x6a   : > { %2303 = vmatmul.mubr.f32.gmra.mrb[6].mxu0 %v2744_v57 }
  0x6b   : > { %2387 = vmatmul.mubr.f32.gmra.mrb[6].mxu1 %v2744_v57  ;;  %2307 = vmatprep.mubr.f32.mxu0 %v2637_v12 }
  0x6c   : > { %2391 = vmatprep.mubr.f32.mxu1 %v2637_v12 }
  0x6e   : > { %2308 = vmatmul.mubr.f32.vlgmr.msra.gmra.mrb[0].mxu0 %v2639_v13 }
  0x6f   : > { %2392 = vmatmul.mubr.f32.vlgmr.msra.gmra.mrb[0].mxu1 %v2639_v13  ;;  %2310 = vmatprep.mubr.f32.mxu0 %v2647_v16 }
  0x70   : > { %2394 = vmatprep.mubr.f32.mxu1 %v2647_v16 }
  0x72   : > { %2311 = vmatmul.mubr.f32.gmra.mrb[2].mxu0 %v2669_v24 }
  0x73   : > { %2395 = vmatmul.mubr.f32.gmra.mrb[2].mxu1 %v2669_v24  ;;  %2313 = vmatprep.mubr.f32.mxu0 %v2676_v26 }
  0x74   : > { %2397 = vmatprep.mubr.f32.mxu1 %v2676_v26 }
  0x76   : > { %2314 = vmatmul.mubr.f32.gmra.mrb[4].mxu0 %v2678_v27 }
  0x77   : > { %2398 = vmatmul.mubr.f32.gmra.mrb[4].mxu1 %v2678_v27  ;;  %2316 = vmatprep.mubr.f32.mxu0 %v2705_v36 }
  0x78   : > { %2400 = vmatprep.mubr.f32.mxu1 %v2705_v36 }
  0x7a   : > { %2317 = vmatmul.mubr.f32.gmra.mrb[6].mxu0 %v2744_v57 }
  0x7b   : > { %2401 = vmatmul.mubr.f32.gmra.mrb[6].mxu1 %v2744_v57 }
  0x91   : > { %v1736_v0 = vpop.permute.xlu1 %1735  ;;  %v1728_v1 = vpop.permute.xlu0 %1727 }
  0x92   : > { %v1762_v21 = vadd.f32 %v2113_v14, %v1728_v1  ;;  %v1764_v26 = vadd.f32 %v2113_v14, %v1736_v0 }
  0x96   : > { %v1740_v2 = vpop.permute.xlu1 %1739  ;;  %v1732_v3 = vpop.permute.xlu0 %1731 }
  0x97   : > { %v1763_v16 = vadd.f32 %v2113_v14, %v1732_v3  ;;  %v1765_v27 = vadd.f32 %v2113_v14, %v1740_v2 }
  0x9a   : > { %v1748_v9 = vpop.permute.xlu1 %1747  ;;  %v1744_v11 = vpop.permute.xlu0 %1743 }
  0x9b   : > { %v1766_v28 = vadd.f32 %v2113_v14, %v1744_v11  ;;  %v1767_v31 = vadd.f32 %v2113_v14, %v1748_v9 }
  0xa0   : > { %v1752_v13 = vpop.permute.xlu0 %1751 }
  0xa1   : > { %v2875_v32 = vadd.f32 %v2113_v14, %v1752_v13 }
  0xa3   : > { %v1788_v10 = vpop.permute.xlu1 %1787 }
  0xa8   : > { %v1792_v33 = vpop.permute.xlu0 %1791 }
  0xa9   : > { %v1756_v12 = vpop.permute.xlu1 %1755 }
  0xaa   : > { %v1769_v37 = vadd.f32 %v2113_v14, %v1756_v12 }
  0xac   : > { %v1800_v62 = vpop.permute.xlu0 %1799 }
  0xb3   : > { %v1796_v25 = vpop.permute.xlu1 %1795 }
  0xb7   : > { %v1804_v53 = vpop.permute.xlu1 %1803 }
 0x141   : > { %v2309_v15 = vpop.f32.mrb[0].mxu0 }
 0x142   : > { %v1771_v18 = vmul.f32 2.0, %v2309_v15  ;;  %v2865_v19 = vpop.f32.mrb[0].mxu1  ;;  %v929_v20 = vpop.f32.mrb[1].mxu0 }
 0x143   : > { %v1770_v23 = vmul.f32 2.0, %v929_v20  ;;  %v2870_v24 = vpop.f32.mrb[1].mxu1  ;;  %v1907_v41 = vsub.f32 %v2865_v19, %v2873_v30 }
 0x144   : > { %v1779_v29 = vsub.f32 %v1763_v16, %v1771_v18  ;;  %v1906_v43 = vsub.f32 %v2870_v24, %v2873_v30 }
 0x145   : > { %v1778_v34 = vsub.f32 %v1762_v21, %v1770_v23  ;;  %v2312_v35 = vpop.f32.mrb[2].mxu0 }
 0x146   : > { %v1847_v36 = vmul.f32 %v2868_v22, %v1779_v29  ;;  %v1773_v38 = vmul.f32 2.0, %v2312_v35  ;;  %v2878_v39 = vpop.f32.mrb[2].mxu1  ;;  %v941_v40 = vpop.f32.mrb[3].mxu0  ;;  %vm1819_vm1 = vcmp.le.f32.partialorder %v1779_v29, %v1792_v33 }
 0x147   : > { %v1846_v42 = vmul.f32 %v2868_v22, %v1778_v34  ;;  %v1772_v44 = vmul.f32 2.0, %v941_v40  ;;  %v2885_v45 = vpop.f32.mrb[3].mxu1  ;;  %v1909_v48 = vsub.f32 %v2878_v39, %v2873_v30  ;;  %vm1818_vm2 = vcmp.le.f32.partialorder %v1778_v34, %v1788_v10 }
 0x148   : > { %v1855_v46 = vsub.f32 1.0, %v1847_v36  ;;  %v1781_v47 = vsub.f32 %v1765_v27, %v1773_v38  ;;  %v1908_v50 = vsub.f32 %v2885_v45, %v2873_v30  ;;  %v2115_v55 = vsel %vm1819_vm1, 1.0, %v2561_v54  ;;  %v1808_v27 = vpop.permute.xlu0 %1807 }
 0x149   : > { %v1854_v49 = vsub.f32 1.0, %v1846_v42  ;;  %v1780_v51 = vsub.f32 %v1764_v26, %v1772_v44  ;;  %v2315_v52 = vpop.f32.mrb[4].mxu0  ;;  %v2114_v61 = vsel %vm1818_vm2, 1.0, %v2561_v54  ;;  %v1812_v26 = vpop.permute.xlu1 %1811  ;;  %vm2003_vm1 = vcmask 7168  }
 0x14a   : > { %v1849_v56 = vmul.f32 %v2868_v22, %v1781_v47  ;;  %v1775_v57 = vmul.f32 2.0, %v2315_v52  ;;  %v2894_v58 = vpop.f32.mrb[4].mxu1  ;;  %v953_v59 = vpop.f32.mrb[5].mxu0  ;;  %v1863_v60 = vmul.f32 %v1855_v46, %v1855_v46  ;;  %vm1871_vm4 = vcmp.gt.f32.partialorder %v1855_v46, 0.0 }
 0x14b   : > { %vm1820_vm3 = vcmp.le.f32.partialorder %v1780_v51, %v1796_v25  ;;  %v1848_v63 = vmul.f32 %v2868_v22, %v1780_v51  ;;  %v1774_v4 = vmul.f32 2.0, %v953_v59  ;;  %v2898_v5 = vpop.f32.mrb[5].mxu1  ;;  %v1911_v17 = vsub.f32 %v2894_v58, %v2873_v30 }
 0x14c   : > { %v1857_v6 = vsub.f32 1.0, %v1849_v56  ;;  %v2901_v7 = vsel %vm1820_vm3, 1.0, %v2561_v54  ;;  %v1783_v8 = vsub.f32 %v1767_v31, %v1775_v57  ;;  %v1910_v0 = vsub.f32 %v2898_v5, %v2873_v30 }
 0x14d   : > { %v1782_v1 = vsub.f32 %v1766_v28, %v1774_v4  ;;  %v2318_v2 = vpop.f32.mrb[6].mxu0  ;;  %v1879_v3 = vmul.f32 %v1863_v60, %v1863_v60  ;;  %v1862_v9 = vmul.f32 %v1854_v49, %v1854_v49  ;;  %v1856_v10 = vsub.f32 1.0, %v1848_v63 }
 0x14e   : > { %v1851_v11 = vmul.f32 %v2868_v22, %v1783_v8  ;;  %v1777_v12 = vmul.f32 2.0, %v2318_v2  ;;  %v2908_v13 = vpop.f32.mrb[6].mxu1  ;;  %v965_v14 = vpop.f32.mrb[7].mxu0  ;;  %vm1870_vm5 = vcmp.gt.f32.partialorder %v1854_v49, 0.0  ;;  %vm1821_vm7 = vcmp.le.f32.partialorder %v1781_v47, %v1800_v62 }
 0x14f   : > { %vm1822_vm6 = vcmp.le.f32.partialorder %v1782_v1, %v1804_v53  ;;  %v1850_v15 = vmul.f32 %v2868_v22, %v1782_v1  ;;  %v1776_v16 = vmul.f32 2.0, %v965_v14  ;;  %v2911_v18 = vpop.f32.mrb[7].mxu1  ;;  %v1913_v25 = vsub.f32 %v2908_v13, %v2873_v30 }
 0x150   : > { %v1859_v20 = vsub.f32 1.0, %v1851_v11  ;;  %v2118_v21 = vsel %vm1822_vm6, 1.0, %v2561_v54  ;;  %v1785_v23 = vsub.f32 %v1769_v37, %v1777_v12  ;;  %v1887_v31 = vsel %vm1871_vm4, %v1879_v3, 1e-18 }
 0x151   : > { %v1858_v28 = vsub.f32 1.0, %v1850_v15  ;;  %v1784_v29 = vsub.f32 %v2875_v32, %v1776_v16  ;;  %v1878_v33 = vmul.f32 %v1862_v9, %v1862_v9  ;;  %v1895_v35 = vmul.f32 %v2115_v55, %v1887_v31 }
 0x152   : > { %v1853_v34 = vmul.f32 %v2868_v22, %v1785_v23  ;;  %v2117_v36 = vsel %vm1821_vm7, 1.0, %v2561_v54  ;;  %v1865_v38 = vmul.f32 %v1857_v6, %v1857_v6  ;;  %vm1873_vm9 = vcmp.gt.f32.partialorder %v1857_v6, 0.0 }
 0x153   : > { %v1852_v40 = vmul.f32 %v2868_v22, %v1784_v29  ;;  %vm1824_vm8 = vcmp.le.f32.partialorder %v1784_v29, %v1812_v26  ;;  %v1886_v37 = vsel %vm1870_vm5, %v1878_v33, 1e-18  ;;  %1940 = vadd.xlane.f32.xlu0 %v1895_v35  ;;  %v1864_v51 = vmul.f32 %v1856_v10, %v1856_v10  ;;  %v1816_v22 = vpop.permute.xlu0 %1815 }
 0x154   : > { %v1861_v42 = vsub.f32 1.0, %v1853_v34  ;;  %v2120_v44 = vsel %vm1824_vm8, 1.0, %v2561_v54  ;;  %v1894_v32 = vmul.f32 %v2114_v61, %v1886_v37  ;;  %v1881_v46 = vmul.f32 %v1865_v38, %v1865_v38 }
 0x155   : > { %v1860_v47 = vsub.f32 1.0, %v1852_v40  ;;  %vm1872_vm10 = vcmp.gt.f32.partialorder %v1856_v10, 0.0  ;;  %vm1823_vm11 = vcmp.le.f32.partialorder %v1783_v8, %v1808_v27  ;;  %v1867_v55 = vmul.f32 %v1859_v20, %v1859_v20 }
 0x156   : > { %1938 = vadd.xlane.f32.xlu1 %v1894_v32  ;;  %v1889_v52 = vsel %vm1873_vm9, %v1881_v46, 1e-18  ;;  %v2119_v53 = vsel %vm1823_vm11, 1.0, %v2561_v54  ;;  %vm1875_vm12 = vcmp.gt.f32.partialorder %v1859_v20, 0.0  ;;  %v1880_v56 = vmul.f32 %v1864_v51, %v1864_v51 }
 0x157   : > { %v1897_v49 = vmul.f32 %v2117_v36, %v1889_v52  ;;  %v1866_v57 = vmul.f32 %v1858_v28, %v1858_v28  ;;  %vm1874_vm13 = vcmp.gt.f32.partialorder %v1858_v28, 0.0  ;;  %v1883_v59 = vmul.f32 %v1867_v55, %v1867_v55 }
 0x158   : > { %vm1825_vm14 = vcmp.le.f32.partialorder %v1785_v23, %v1816_v22  ;;  %v1869_v60 = vmul.f32 %v1861_v42, %v1861_v42  ;;  %vm1877_vm15 = vcmp.gt.f32.partialorder %v1861_v42, 0.0  ;;  %v1888_v61 = vsel %vm1872_vm10, %v1880_v56, 1e-18 }
 0x159   : > { %v1882_v62 = vmul.f32 %v1866_v57, %v1866_v57  ;;  %v2121_v63 = vsel %vm1825_vm14, 1.0, %v2561_v54  ;;  %v1868_v4 = vmul.f32 %v1860_v47, %v1860_v47  ;;  %v1896_v6 = vmul.f32 %v2901_v7, %v1888_v61 }
 0x15a   : > { %1944 = vadd.xlane.f32.xlu1 %v1897_v49  ;;  %v1891_v8 = vsel %vm1875_vm12, %v1883_v59, 1e-18  ;;  %v1885_v1 = vmul.f32 %v1869_v60, %v1869_v60  ;;  %vm1876_vm0 = vcmp.gt.f32.partialorder %v1860_v47, 0.0  ;;  %v1915_v11 = vmul.f32 %v1907_v41, %v1895_v35 }
 0x15b   : > { %v1899_v2 = vmul.f32 %v2119_v53, %v1891_v8  ;;  %v1890_v3 = vsel %vm1874_vm13, %v1882_v62, 1e-18  ;;  %v1884_v9 = vmul.f32 %v1868_v4, %v1868_v4  ;;  %1942 = vadd.xlane.f32.xlu0 %v1896_v6  ;;  %v1914_v14 = vmul.f32 %v1906_v43, %v1894_v32 }
 0x15c   : > { %v1898_v10 = vmul.f32 %v2118_v21, %v1890_v3  ;;  %v1893_v12 = vsel %vm1877_vm15, %v1885_v1, 1e-18  ;;  %v1917_v7 = vmul.f32 %v1909_v48, %v1897_v49  ;;  %v1916_v20 = vmul.f32 %v1908_v50, %v1896_v6 }
 0x15d   : > { %v1901_v15 = vmul.f32 %v2121_v63, %v1893_v12  ;;  %v1892_v16 = vsel %vm1876_vm0, %v1884_v9, 1e-18  ;;  %v1919_v19 = vmul.f32 %v1911_v17, %v1899_v2  ;;  %v1912_v41 = vsub.f32 %v2911_v18, %v2873_v30 }
 0x15e   : > { %1948 = vadd.xlane.f32.xlu1 %v1899_v2  ;;  %v1900_v24 = vmul.f32 %v2120_v44, %v1892_v16  ;;  %v1918_v39 = vmul.f32 %v1910_v0, %v1898_v10  ;;  %vm192_vm2 = vcmask 0  }
 0x15f   : > { %v1921_v43 = vmul.f32 %v1913_v25, %v1901_v15  ;;  %1946 = vadd.xlane.f32.xlu0 %v1898_v10  ;;  %193 = vst.msk [vmem:[%s187_s23] sm:$0x1] %vm192_vm2, %v2561_v54 }
 0x160   : > { %v1920_v45 = vmul.f32 %v1912_v41, %v1900_v24 }
 0x162   : > { %1952 = vadd.xlane.f32.xlu1 %v1901_v15 }
 0x163   : > { %1950 = vadd.xlane.f32.xlu0 %v1900_v24 }
 0x166   : > { %1924 = vadd.xlane.f32.xlu1 %v1915_v11 }
 0x167   : > { %1922 = vadd.xlane.f32.xlu0 %v1914_v14 }
 0x16a   : > { %1928 = vadd.xlane.f32.xlu1 %v1917_v7 }
 0x16b   : > { %1926 = vadd.xlane.f32.xlu0 %v1916_v20 }
 0x16e   : > { %1932 = vadd.xlane.f32.xlu1 %v1919_v19 }
 0x16f   : > { %1930 = vadd.xlane.f32.xlu0 %v1918_v39 }
 0x172   : > { %1936 = vadd.xlane.f32.xlu1 %v1921_v43 }
 0x173   : > { %1934 = vadd.xlane.f32.xlu0 %v1920_v45 }
 0x1e0   : > { %v1941_v48 = vpop.xlane.xlu0 %1940 }
 0x1e1   : > { %2519 = vrcp.f32 %v1941_v48 }
 0x1e3   : > { %v1939_v50 = vpop.xlane.xlu1 %1938 }
 0x1e4   : > { %2521 = vrcp.f32 %v1939_v50 }
 0x1e7   : > { %v1945_v58 = vpop.xlane.xlu1 %1944 }
 0x1e8   : > { %2523 = vrcp.f32 %v1945_v58  ;;  %v1943_v30 = vpop.xlane.xlu0 %1942 }
 0x1e9   : > { %2525 = vrcp.f32 %v1943_v30 }
 0x1eb   : > { %v1949_v5 = vpop.xlane.xlu1 %1948  ;;  %v2520_v17 = vpop.eup %2519 }
 0x1ec   : > { %2527 = vrcp.f32 %v1949_v5  ;;  %v1963_v0 = vmul.f32 %v2520_v17, %v1941_v48  ;;  %v1947_v13 = vpop.xlane.xlu0 %1946 }
 0x1ed   : > { %2529 = vrcp.f32 %v1947_v13 }
 0x1ee   : > { %v2522_v18 = vpop.eup %2521  ;;  %v1971_v21 = vsub.f32 2.0, %v1963_v0 }
 0x1ef   : > { %v1962_v23 = vmul.f32 %v2522_v18, %v1939_v50  ;;  %v1953_v25 = vpop.xlane.xlu1 %1952 }
 0x1f0   : > { %2531 = vrcp.f32 %v1953_v25  ;;  %v1951_v27 = vpop.xlane.xlu0 %1950  ;;  %v1979_v28 = vmul.f32 %v2520_v17, %v1971_v21 }
 0x1f1   : > { %v1970_v26 = vsub.f32 2.0, %v1962_v23  ;;  %2533 = vrcp.f32 %v1951_v27 }
 0x1f2   : > { %v2524_v29 = vpop.eup %2523 }
 0x1f3   : > { %v1965_v31 = vmul.f32 %v2524_v29, %v1945_v58  ;;  %v1925_v33 = vpop.xlane.xlu1 %1924  ;;  %v1978_v34 = vmul.f32 %v2522_v18, %v1970_v26  ;;  %v2526_v35 = vpop.eup %2525 }
 0x1f4   : > { %v1987_v36 = vmul.f32 %v1979_v28, %v1925_v33  ;;  %v1964_v40 = vmul.f32 %v2526_v35, %v1943_v30  ;;  %v1923_v37 = vpop.xlane.xlu0 %1922 }
 0x1f5   : > { %v1973_v38 = vsub.f32 2.0, %v1965_v31  ;;  %v1986_v44 = vmul.f32 %v1978_v34, %v1923_v37  ;;  %v1994_v37 = vld [vmem:[%s187_s23] sm:$0x1] }
 0x1f6   : > { %v2528_v42 = vpop.eup %2527  ;;  %v1972_v32 = vsub.f32 2.0, %v1964_v40  ;;  %v1996_v53 = vmul.f32 %v1987_v36, %v1987_v36 }
 0x1f7   : > { %v1967_v46 = vmul.f32 %v2528_v42, %v1949_v5  ;;  %v1981_v47 = vmul.f32 %v2524_v29, %v1973_v38  ;;  %v1929_v51 = vpop.xlane.xlu1 %1928  ;;  %v2530_v52 = vpop.eup %2529  ;;  %v1995_v55 = vmul.f32 %v1986_v44, %v1986_v44 }
 0x1f8   : > { %v1966_v49 = vmul.f32 %v2530_v52, %v1947_v13  ;;  %v1980_v56 = vmul.f32 %v2526_v35, %v1972_v32  ;;  %v1927_v57 = vpop.xlane.xlu0 %1926  ;;  %v2005_v6 = vsel %vm2003_vm1, %v1996_v53, 0.0 }
 0x1f9   : > { %v1975_v22 = vsub.f32 2.0, %v1967_v46  ;;  %v1989_v60 = vmul.f32 %v1981_v47, %v1929_v51  ;;  %v2004_v8 = vsel %vm2003_vm1, %v1995_v55, 0.0 }
 0x1fa   : > { %v2532_v59 = vpop.eup %2531  ;;  %v1974_v61 = vsub.f32 2.0, %v1966_v49  ;;  %v1988_v1 = vmul.f32 %v1980_v56, %v1927_v57  ;;  %v2006_v16 = vadd.f32 %v2005_v6, %v2004_v8 }
 0x1fb   : > { %v1969_v62 = vmul.f32 %v2532_v59, %v1953_v25  ;;  %v1933_v63 = vpop.xlane.xlu1 %1932  ;;  %v2534_v4 = vpop.eup %2533  ;;  %v1983_v2 = vmul.f32 %v2528_v42, %v1975_v22  ;;  %v1998_v12 = vmul.f32 %v1989_v60, %v1989_v60 }
 0x1fc   : > { %v1968_v9 = vmul.f32 %v2534_v4, %v1951_v27  ;;  %v1982_v11 = vmul.f32 %v2530_v52, %v1974_v61  ;;  %v1931_v10 = vpop.xlane.xlu0 %1930  ;;  %v1997_v14 = vmul.f32 %v1988_v1, %v1988_v1 }
 0x1fd   : > { %v1977_v3 = vsub.f32 2.0, %v1969_v62  ;;  %v1991_v7 = vmul.f32 %v1983_v2, %v1933_v63  ;;  %v2009_v50 = vsel %vm2003_vm1, %v1998_v12, 0.0 }
 0x1fe   : > { %v1976_v15 = vsub.f32 2.0, %v1968_v9  ;;  %v1990_v20 = vmul.f32 %v1982_v11, %v1931_v10  ;;  %v2007_v24 = vsel %vm2003_vm1, %v1997_v14, 0.0 }
 0x1ff   : > { %v1985_v19 = vmul.f32 %v2532_v59, %v1977_v3  ;;  %v1937_v41 = vpop.xlane.xlu1 %1936  ;;  %v2008_v39 = vadd.f32 %v2007_v24, %v2006_v16  ;;  %v2000_v58 = vmul.f32 %v1991_v7, %v1991_v7 }
 0x200   : > { %v1999_v43 = vmul.f32 %v1990_v20, %v1990_v20  ;;  %v1984_v45 = vmul.f32 %v2534_v4, %v1976_v15  ;;  %v1935_v48 = vpop.xlane.xlu0 %1934 }
 0x201   : > { %v1993_v30 = vmul.f32 %v1985_v19, %v1937_v41  ;;  %v2010_v5 = vadd.f32 %v2009_v50, %v2008_v39  ;;  %v2013_v21 = vsel %vm2003_vm1, %v2000_v58, 0.0 }
 0x202   : > { %v2011_v17 = vsel %vm2003_vm1, %v1999_v43, 0.0  ;;  %v1992_v0 = vmul.f32 %v1984_v45, %v1935_v48 }
 0x203   : > { %v2012_v13 = vadd.f32 %v2011_v17, %v2010_v5  ;;  %v2002_v23 = vmul.f32 %v1993_v30, %v1993_v30 }
 0x204   : > { %v2001_v18 = vmul.f32 %v1992_v0, %v1992_v0 }
 0x205   : > { %v2014_v26 = vadd.f32 %v2013_v21, %v2012_v13  ;;  %v2017_v28 = vsel %vm2003_vm1, %v2002_v23, 0.0 }
 0x206   : > { %v2015_v25 = vsel %vm2003_vm1, %v2001_v18, 0.0 }
 0x207   : > { %v2016_v27 = vadd.f32 %v2015_v25, %v2014_v26 }
 0x209   : > { %v2018_v29 = vadd.f32 %v2017_v28, %v2016_v27 }
 0x20b   : > { %2019 = vadd.xlane.f32.xlu0 %v2018_v29 }
 0x298   : > { %v2020_v31 = vpop.xlane.xlu0 %2019 }
 0x299   : > { %v2021_v33 = vrot.slane %v2020_v31, 4 }
 0x29b   : > { %v2022_v34 = vadd.f32 %v2021_v33, %v2020_v31 }
 0x29d   : > { %v2023_v35 = vrot.slane %v2022_v34, 2 }
 0x29f   : > { %v2024_v36 = vadd.f32 %v2023_v35, %v2022_v34 }
 0x2a1   : > { %v2025_v38 = vrot.slane %v2024_v36, 1 }
 0x2a3   : > { %v2026_v40 = vadd.f32 %v2025_v38, %v2024_v36 }
 0x2a5   : > { %2484 = vpush %v2026_v40 }
 0x2d6   : > { %s2485_s24 = spop %2484 }
 0x2d7   : > { %v2028_v42 = vstv %s2485_s24 }
 0x2d8   : > { %v2029_v44 = vadd.f32 %v2028_v42, %v1994_v37 }
 0x2da   : > { %2031 = vst.msk [vmem:[%s187_s23] sm:$0x1] %vm192_vm2, %v2029_v44 }
 0x2db PF: > { %s12_s11 = sadd.s32 1, %s2557_s11   ;;  %s2977_s9 = smov %s2553_s10 }
 0x2dc   : > { %p9_p5 = scmp.ge.s32.totalorder %s12_s11, 4   ;;  %s2978_s10 = smov %s2980_s12 }
 0x2de   :  { %11 = sbr.rel (!%p9_p5) target bundleno = 2 (0x2), region = 65 }

</bundles_post_ra>
